<compile_context>
chip_gen: v7x
topology: tpu7x:2x2x1
jax: 0.10.0
libtpu: 0.0.40
codegen_flags: <defaults>
</compile_context>

<pallas_src>
import jax
import jax.numpy as jnp
from jax.experimental import pallas as pl
from jax.experimental.pallas import tpu as pltpu


def _round_up(x, m):
    return ((x + m - 1) // m) * m


def _cdiv(a, b):
    return (a + b - 1) // b


def _prelu2_kernel(alpha_ref, re_ref, im_ref, ore_ref, oim_ref):
    # alpha: (1,1) scalar in SMEM; slabs: (TM, LANE) f32 tiles in VMEM.
    a = alpha_ref[0, 0]
    vr = re_ref[...]
    vi = im_ref[...]
    ore_ref[...] = jnp.where(vr > 0, vr, a * vr)
    oim_ref[...] = jnp.where(vi > 0, vi, a * vi)


def _choose_layout(n, tm, lane):
    """Pick (lane_eff, rows, rows_p, tm_eff) for a flat f32 buffer of n elems."""
    # Prefer a lane width (multiple of 128) that divides n -> no padding pass.
    lane_eff = None
    if n % 128 == 0:
        for c in (lane, 1024, 512, 256, 128):
            if 128 <= c <= lane and c % 128 == 0 and n % c == 0:
                lane_eff = c
                break
    if lane_eff is None:
        lane_eff = min(lane, _round_up(n, 128))   # ragged fallback (padded)
    rows = _cdiv(n, lane_eff)

    # Keep per-step tile bytes roughly constant if lane_eff ended up narrow.
    tm_target = tm * max(1, lane // lane_eff)

    if rows <= 8:
        # Tiny input: single grid step; block == full array dims (legal even
        # when rows is not a multiple of 8).
        rows_p, tm_eff = rows, rows
    elif rows <= 2 * tm_target:
        # Exactly two grid steps so v7x's two TensorCores both get work.
        tm_eff = _round_up(_cdiv(rows, 2), 8)
        rows_p = 2 * tm_eff
    else:
        tm_eff = tm_target
        rows_p = _round_up(rows, tm_eff)
    return lane_eff, rows, rows_p, tm_eff


def complex_prelu(x, alpha, *, tm=256, lane=1024):
    """x: complex64 array (any shape). alpha: scalar PReLU weight."""
    assert tm % 8 == 0 and tm > 0, "tm must be a positive multiple of 8"
    assert lane % 128 == 0 and lane > 0, "lane must be a positive multiple of 128"

    orig_shape = x.shape
    n = x.size

    a = jnp.asarray(alpha, jnp.float32)
    assert a.size == 1, "only scalar (num_parameters=1) PReLU alpha is supported"
    a = a.reshape(1, 1)

    # Real / imag extraction: one strided pass each.  lax has no
    # complex64 -> f32 bitcast, so a zero-copy interleaved view is not
    # available; this is the minimum wrapper traffic.
    re = jnp.real(x).astype(jnp.float32).reshape(-1)
    im = jnp.imag(x).astype(jnp.float32).reshape(-1)

    lane_eff, rows, rows_p, tm_eff = _choose_layout(n, tm, lane)
    padded = rows_p * lane_eff
    if padded != n:
        # Ragged fallback only; power-of-two shapes take the no-pad path.
        re = jnp.pad(re, (0, padded - n))      # PReLU(0) == 0, pad is harmless
        im = jnp.pad(im, (0, padded - n))
    re = re.reshape(rows_p, lane_eff)
    im = im.reshape(rows_p, lane_eff)

    slab_spec = pl.BlockSpec((tm_eff, lane_eff), lambda i: (i, 0))

    out_re, out_im = pl.pallas_call(
        _prelu2_kernel,
        out_shape=(
            jax.ShapeDtypeStruct((rows_p, lane_eff), jnp.float32),
            jax.ShapeDtypeStruct((rows_p, lane_eff), jnp.float32),
        ),
        grid=(rows_p // tm_eff,),
        in_specs=[
            pl.BlockSpec(memory_space=pltpu.MemorySpace.SMEM),   # alpha
            slab_spec,                                           # real slab
            slab_spec,                                           # imag slab
        ],
        out_specs=(slab_spec, slab_spec),
        compiler_params=pltpu.CompilerParams(
            dimension_semantics=("parallel",)),
        # re/im slabs are intermediates: reuse their HBM buffers for outputs.
        input_output_aliases={1: 0, 2: 1},
    )(a, re, im)

    out_re = out_re.reshape(-1)
    out_im = out_im.reshape(-1)
    if padded != n:
        out_re = out_re[:n]
        out_im = out_im[:n]
    y = jax.lax.complex(out_re, out_im)
    return y.reshape(orig_shape)


if __name__ == "__main__":
    key = jax.random.PRNGKey(0)
    k_re, k_im = jax.random.split(key)

    N, C, H, W = 2, 4, 16, 16
    x_re = jax.random.normal(k_re, (N, C, H, W), dtype=jnp.float32)
    x_im = jax.random.normal(k_im, (N, C, H, W), dtype=jnp.float32)
    x = jax.lax.complex(x_re, x_im)  # complex64 input

    alpha = 0.25  # torch.nn.PReLU() default single-parameter init

    run = jax.jit(complex_prelu)
    out = run(x, alpha)
    out = jax.block_until_ready(out)

    # Reference check against pure-JAX PReLU on real/imag parts.
    ref = jax.lax.complex(
        jnp.where(x_re > 0, x_re, alpha * x_re),
        jnp.where(x_im > 0, x_im, alpha * x_im),
    )
    assert out.shape == (N, C, H, W) and out.dtype == jnp.complex64
    assert jnp.allclose(out, ref, atol=1e-6, rtol=1e-6)

    print("KERNEL_OK")
</pallas_src>

<mosaic_0001>
module attributes {stable_mosaic.version = 11 : i64} {
  func.func @_prelu2_kernel(%arg0: i32, %arg1: memref<1x1xf32, #tpu.memory_space<smem>>, %arg2: memref<2x1024xf32, #tpu.memory_space<vmem>>, %arg3: memref<2x1024xf32, #tpu.memory_space<vmem>>, %arg4: memref<2x1024xf32, #tpu.memory_space<vmem>>, %arg5: memref<2x1024xf32, #tpu.memory_space<vmem>>) attributes {dimension_semantics = [#tpu.dimension_semantics<parallel>], iteration_bounds = array<i64: 1>, scalar_prefetch = 0 : i64, scratch_operands = 0 : i64, tpu.core_type = #tpu.core_type<tc>, window_params = [{transform_indices = @transform_0, window_bounds = array<i64: 1, 1>}, {transform_indices = @transform_1, window_bounds = array<i64: 2, 1024>}, {transform_indices = @transform_2, window_bounds = array<i64: 2, 1024>}, {transform_indices = @transform_3, window_bounds = array<i64: 2, 1024>}, {transform_indices = @transform_4, window_bounds = array<i64: 2, 1024>}]} {
    %c0 = arith.constant 0 : index
    %c0_0 = arith.constant 0 : index
    %0 = memref.load %arg1[%c0, %c0_0] : memref<1x1xf32, #tpu.memory_space<smem>>
    %c0_1 = arith.constant 0 : index
    %c0_2 = arith.constant 0 : index
    %1 = vector.load %arg2[%c0_1, %c0_2] : memref<2x1024xf32, #tpu.memory_space<vmem>>, vector<2x1024xf32>
    %c0_3 = arith.constant 0 : index
    %c0_4 = arith.constant 0 : index
    %2 = vector.load %arg3[%c0_3, %c0_4] : memref<2x1024xf32, #tpu.memory_space<vmem>>, vector<2x1024xf32>
    %cst = arith.constant 0.000000e+00 : f32
    %3 = vector.broadcast %cst : f32 to vector<2x1024xf32>
    %4 = arith.cmpf ogt, %1, %3 : vector<2x1024xf32>
    %5 = vector.broadcast %0 : f32 to vector<2x1024xf32>
    %6 = arith.mulf %5, %1 : vector<2x1024xf32>
    %7 = arith.select %4, %1, %6 : vector<2x1024xi1>, vector<2x1024xf32>
    %c0_5 = arith.constant 0 : index
    %c0_6 = arith.constant 0 : index
    %8 = vector.load %arg4[%c0_5, %c0_6] : memref<2x1024xf32, #tpu.memory_space<vmem>>, vector<2x1024xf32>
    tpu.vector_store %arg4[%c0_5, %c0_6], %7 {strides = array<i32>} : memref<2x1024xf32, #tpu.memory_space<vmem>>, vector<2x1024xf32>,
    %cst_7 = arith.constant 0.000000e+00 : f32
    %9 = vector.broadcast %cst_7 : f32 to vector<2x1024xf32>
    %10 = arith.cmpf ogt, %2, %9 : vector<2x1024xf32>
    %11 = vector.broadcast %0 : f32 to vector<2x1024xf32>
    %12 = arith.mulf %11, %2 : vector<2x1024xf32>
    %13 = arith.select %10, %2, %12 : vector<2x1024xi1>, vector<2x1024xf32>
    %c0_8 = arith.constant 0 : index
    %c0_9 = arith.constant 0 : index
    %14 = vector.load %arg5[%c0_8, %c0_9] : memref<2x1024xf32, #tpu.memory_space<vmem>>, vector<2x1024xf32>
    tpu.vector_store %arg5[%c0_8, %c0_9], %13 {strides = array<i32>} : memref<2x1024xf32, #tpu.memory_space<vmem>>, vector<2x1024xf32>,
    return
  }
  func.func @transform_0(%arg0: i32) -> (i32, i32) {
    %c0_i32 = arith.constant 0 : i32
    %c0_i32_0 = arith.constant 0 : i32
    %c0_i32_1 = arith.constant 0 : i32
    return %c0_i32, %c0_i32_0 : i32, i32
  }
  func.func @transform_1(%arg0: i32) -> (i32, i32) {
    %c0_i32 = arith.constant 0 : i32
    %c0_i32_0 = arith.constant 0 : i32
    return %arg0, %c0_i32 : i32, i32
  }
  func.func @transform_2(%arg0: i32) -> (i32, i32) {
    %c0_i32 = arith.constant 0 : i32
    %c0_i32_0 = arith.constant 0 : i32
    return %arg0, %c0_i32 : i32, i32
  }
  func.func @transform_3(%arg0: i32) -> (i32, i32) {
    %c0_i32 = arith.constant 0 : i32
    %c0_i32_0 = arith.constant 0 : i32
    return %arg0, %c0_i32 : i32, i32
  }
  func.func @transform_4(%arg0: i32) -> (i32, i32) {
    %c0_i32 = arith.constant 0 : i32
    %c0_i32_0 = arith.constant 0 : i32
    return %arg0, %c0_i32 : i32, i32
  }
}

</mosaic_0001>

<bundles_post_ra>
// kernel: custom-call
= control target key start
LH: loop header
LB: loop body
LE: loop exit
PB: predicated region body
PF: predicated region fallthrough
CT: control target
= control target key end

     0   :  { %2 = vsyncpa [#allocation0], 0  ;;  %s61_s0 = inlined_call_operand.hbm [shape: c64[2,4,16,16], index: 0, kind: input, shape index: {}]   ;;  %s62_s1 = inlined_call_operand.vmem [shape: f32[2,4,16,16], index: 1, kind: output, shape index: {}]  }
   0x1   :  { %s3_s8 = sshll.u32 %s62_s1, 4  ;;  %s9_s11 = scalar_lea.hbm %s61_s0, 2048  ;;  %s4_s8 = int_to_ptr.vmem [resolvable:$true] %s3_s8 }
   0x2   :  { %p10_p0 = scmp.ne.s32.totalorder %s61_s0, %s9_s11  ;;  %s11_s16 = scalar_lea.hbm %s61_s0, 4096 }
   0x3   :  { %p12_p1 = scmp.lt.u32.totalorder %s11_s16, %s9_s11  ;;  %p13_p2 = scmp.lt.u32.totalorder %s9_s11, %s61_s0 }
   0x5   :  { %p14_p3 = por %p13_p2, %p12_p1 }
   0x7   :  { %p15_p4 = pnand %p14_p3, %p10_p0 }
   0x9   :  { %18 = shalt.err (!%p15_p4)  }
   0xa   :  { %s19_s1 = scalar_lea.vmem %s4_s8, 2048  ;;  %p24_p6 = scmp.lt.s32.totalorder %s4_s8, %s4_s8 }
   0xb   :  { %p20_p5 = scmp.ne.s32.totalorder %s4_s8, %s19_s1  ;;  %p25_p7 = scmp.lt.s32.totalorder %s19_s1, %s19_s1 }
   0xd   :  { %p26_p8 = por %p25_p7, %p24_p6 }
   0xf   :  { %p27_p9 = pnand %p26_p8, %p20_p5 }
  0x11   :  { %30 = shalt.err (!%p27_p9)  }
  0x12   :  { %6 = dma.hbm_to_vmem [thread:$0]  %s61_s0, 2048, %s4_s8, [#allocation0] }
  0x13   :  { %31 = dma.done.wait [#allocation0], 2048  }
  0x14   :  { %32 = vsyncadd [#allocation0], 4294965248 }
  0x15   :  { %8 = vsyncpa [#allocation0], 1 }

// kernel: custom-call.1
= control target key start
LH: loop header
LB: loop body
LE: loop exit
PB: predicated region body
PF: predicated region fallthrough
CT: control target
= control target key end

     0   :  { %s59_s0 = inlined_call_operand.hbm [shape: c64[2,4,16,16], index: 0, kind: input, shape index: {}]   ;;  %s60_s1 = inlined_call_operand.vmem [shape: f32[2,4,16,16], index: 1, kind: output, shape index: {}]  }
   0x1   :  { %s2_s8 = scalar_lea.hbm %s59_s0, 2048 }
   0x2   :  { %3 = vsyncpa [#allocation0], 0  ;;  %s4_s11 = sshll.u32 %s60_s1, 4  ;;  %s34_s14 = scalar_lea.hbm %s59_s0, 4096  ;;  %s5_s11 = int_to_ptr.vmem [resolvable:$true] %s4_s11 }
   0x3   :  { %p11_p0 = scmp.ne.s32.totalorder %s2_s8, %s34_s14  ;;  %p13_p1 = scmp.lt.u32.totalorder %s2_s8, %s59_s0 }
   0x4   :  { %p14_p2 = scmp.lt.u32.totalorder %s34_s14, %s34_s14  ;;  %p16_p4 = scmp.lt.u32.totalorder %s34_s14, %s2_s8 }
   0x6   :  { %p15_p3 = por %p14_p2, %p13_p1 }
   0x8   :  { %p17_p5 = por %p16_p4, %p15_p3 }
   0xa   :  { %p18_p6 = pnand %p17_p5, %p11_p0 }
   0xc   :  { %21 = shalt.err (!%p18_p6)  }
   0xd   :  { %s22_s17 = scalar_lea.vmem %s5_s11, 2048  ;;  %p27_p8 = scmp.lt.s32.totalorder %s5_s11, %s5_s11 }
   0xe   :  { %p23_p7 = scmp.ne.s32.totalorder %s5_s11, %s22_s17  ;;  %p28_p9 = scmp.lt.s32.totalorder %s22_s17, %s22_s17 }
  0x10   :  { %p29_p10 = por %p28_p9, %p27_p8 }
  0x12   :  { %p30_p11 = pnand %p29_p10, %p23_p7 }
  0x14   :  { %33 = shalt.err (!%p30_p11)  }
  0x15   :  { %7 = dma.hbm_to_vmem [thread:$0]  %s2_s8, 2048, %s5_s11, [#allocation0] }
  0x16   :  { %35 = dma.done.wait [#allocation0], 2048  }
  0x17   :  { %36 = vsyncadd [#allocation0], 4294965248 }
  0x18   :  { %9 = vsyncpa [#allocation0], 1 }

// kernel: custom-call.2
= control target key start
LH: loop header
LB: loop body
LE: loop exit
PB: predicated region body
PF: predicated region fallthrough
CT: control target
= control target key end

     0   :  { %s126_s0 = inlined_call_operand.vmem [shape: f32[2,4,16,16], index: 0, kind: input, shape index: {}]   ;;  %s127_s1 = inlined_call_operand.vmem [shape: f32[2,4,16,16], index: 1, kind: input, shape index: {}]   ;;  %s128_s2 = inlined_call_operand.hbm [shape: c64[2,4,16,16], index: 2, kind: output, shape index: {}]  }
   0x1   :  { %s87_s11 = scalar_lea.hbm %s128_s2, 2048 }
   0x2   :  { %4 = vsyncpa [#allocation0], 0  ;;  %s5_s14 = sshll.u32 %s126_s0, 4  ;;  %s6_s14 = int_to_ptr.vmem [resolvable:$true] %s5_s14 }
   0x3   :  { %s18_s15 = scalar_lea.vmem %s6_s14, 2048  ;;  %p23_p1 = scmp.lt.s32.totalorder %s6_s14, %s6_s14 }
   0x4   :  { %p19_p0 = scmp.ne.s32.totalorder %s6_s14, %s18_s15  ;;  %p24_p2 = scmp.lt.s32.totalorder %s18_s15, %s18_s15 }
   0x6   :  { %p25_p3 = por %p24_p2, %p23_p1 }
   0x8   :  { %p26_p4 = pnand %p25_p3, %p19_p0 }
   0xa   :  { %29 = shalt.err (!%p26_p4)  }
   0xb   :  { %p31_p5 = scmp.ne.s32.totalorder %s128_s2, %s87_s11  ;;  %s32_s0 = scalar_lea.hbm %s128_s2, 4096 }
   0xc   :  { %p33_p6 = scmp.lt.u32.totalorder %s32_s0, %s87_s11  ;;  %p34_p7 = scmp.lt.u32.totalorder %s87_s11, %s128_s2 }
   0xe   :  { %p35_p8 = por %p34_p7, %p33_p6 }
  0x10   :  { %p36_p9 = pnand %p35_p8, %p31_p5 }
  0x12   :  { %39 = shalt.err (!%p36_p9)  }
  0x13   :  { %8 = dma.vmem_to_hbm [thread:$0]  %s6_s14, 2048, %s128_s2, [#allocation0] }
  0x14   :  { %65 = dma.done.wait [#allocation0], 2048  }
  0x15   :  { %66 = vsyncadd [#allocation0], 4294965248 }
  0x16   :  { %10 = vsyncpa [#allocation0], 1 }
  0x17   :  { %11 = vsyncpa [#allocation1], 0  ;;  %s12_s28 = sshll.u32 %s127_s1, 4  ;;  %s13_s28 = int_to_ptr.vmem [resolvable:$true] %s12_s28 }
  0x18   :  { %s40_s29 = scalar_lea.vmem %s13_s28, 2048  ;;  %p45_p11 = scmp.lt.s32.totalorder %s13_s28, %s13_s28 }
  0x19   :  { %p41_p10 = scmp.ne.s32.totalorder %s13_s28, %s40_s29  ;;  %p46_p12 = scmp.lt.s32.totalorder %s40_s29, %s40_s29 }
  0x1b   :  { %p47_p13 = por %p46_p12, %p45_p11 }
  0x1d   :  { %p48_p0 = pnand %p47_p13, %p41_p10 }
  0x1f   :  { %51 = shalt.err (!%p48_p0)  }
  0x20   :  { %p53_p1 = scmp.ne.s32.totalorder %s87_s11, %s32_s0  ;;  %p56_p2 = scmp.lt.u32.totalorder %s32_s0, %s32_s0 }
  0x22   :  { %p57_p3 = por %p56_p2, %p34_p7 }
  0x24   :  { %p59_p4 = por %p57_p3, %p33_p6 }
  0x26   :  { %p60_p5 = pnand %p59_p4, %p53_p1 }
  0x28   :  { %63 = shalt.err (!%p60_p5)  }
  0x29   :  { %15 = dma.vmem_to_hbm [thread:$0]  %s13_s28, 2048, %s87_s11, [#allocation1] }
  0x2a   :  { %67 = dma.done.wait [#allocation1], 2048  }
  0x2b   :  { %68 = vsyncadd [#allocation1], 4294965248 }
  0x2c   :  { %17 = vsyncpa [#allocation1], 1 }

// kernel: complex_prelu.1
= control target key start
LH: loop header
LB: loop body
LE: loop exit
PB: predicated region body
PF: predicated region fallthrough
CT: control target
= control target key end

     0   :  { %s99_s0 = inlined_call_operand.<no memory space> [shape: f32[1,1], index: 0, kind: input, shape index: {}]   ;;  %s100_s1 = inlined_call_operand.vmem [shape: f32[2,1024], index: 1, kind: input, shape index: {}, may-alias: {1,3}]   ;;  %s101_s2 = inlined_call_operand.vmem [shape: f32[2,1024], index: 2, kind: input, shape index: {}, may-alias: {2,4}]   ;;  %s102_s3 = inlined_call_operand.vmem [shape: f32[2,1024], index: 3, kind: output, shape index: {0}, may-alias: {1,3}]   ;;  %s103_s4 = inlined_call_operand.vmem [shape: f32[2,1024], index: 4, kind: output, shape index: {1}, may-alias: {2,4}]  }
   0x1   :  { %v18_v0 = vld [vmem:[%s100_s1] sm:$0xff]  ;;  %v24_v1 = vstv %s99_s0  ;;  %v19_v2 = vld [vmem:[%s100_s1 + $0x8] sm:$0xff] }
   0x2   :  { %v20_v3 = vld [vmem:[%s101_s2] sm:$0xff]  ;;  %vm22_vm0 = vcmp.gt.f32.partialorder %v18_v0, 0.0  ;;  %v25_v4 = vmul.f32 %v24_v1, %v18_v0  ;;  %vm23_vm1 = vcmp.gt.f32.partialorder %v19_v2, 0.0  ;;  %v26_v5 = vmul.f32 %v24_v1, %v19_v2  ;;  %v21_v6 = vld [vmem:[%s101_s2 + $0x8] sm:$0xff] }
   0x3   :  { %vm31_vm2 = vcmp.gt.f32.partialorder %v20_v3, 0.0  ;;  %v33_v7 = vmul.f32 %v24_v1, %v20_v3  ;;  %vm32_vm3 = vcmp.gt.f32.partialorder %v21_v6, 0.0  ;;  %v34_v8 = vmul.f32 %v24_v1, %v21_v6 }
   0x4   :  { %v27_v9 = vsel %vm22_vm0, %v18_v0, %v25_v4  ;;  %v28_v10 = vsel %vm23_vm1, %v19_v2, %v26_v5 }
   0x5   :  { %29 = vst [vmem:[%s102_s3] sm:$0xff] %v27_v9  ;;  %30 = vst [vmem:[%s102_s3 + $0x8] sm:$0xff] %v28_v10  ;;  %v35_v11 = vsel %vm31_vm2, %v20_v3, %v33_v7  ;;  %v36_v12 = vsel %vm32_vm3, %v21_v6, %v34_v8 }
   0x6   :  { %37 = vst [vmem:[%s103_s4] sm:$0xff] %v35_v11  ;;  %38 = vst [vmem:[%s103_s4 + $0x8] sm:$0xff] %v36_v12 }

</bundles_post_ra>
